<compile_context>
chip_gen: v5e
topology: v5e:2x2
jax: 0.10.0
libtpu: 0.0.40
codegen_flags: <defaults>
</compile_context>

<pallas_src>
import functools

import jax
import jax.numpy as jnp
from jax import lax
from jax.experimental import pallas as pl
from jax.experimental.pallas import tpu as pltpu

MAX_NORM = 1.0
_RENORM_EPS = 1e-7  # torch.embedding_renorm_ divides by (norm + 1e-7)


def _round_up(x: int, m: int) -> int:
    return (x + m - 1) // m * m


def _cbow_kernel(idx_ref, emb_ref, w_ref, b_ref, out_ref, *, ctx: int):
    # idx_ref : (TB*C, 1) int32 -- flattened context indices for this batch tile
    # emb_ref : (V, D)    f32   -- full embedding table, VMEM-resident
    # w_ref   : (D, O)    f32   -- linear weight in (K, N) layout
    # b_ref   : (1, O)    f32   -- linear bias
    # out_ref : (TB, O)   f32   -- dense output slab for this batch tile
    rows = idx_ref.shape[0]            # TB * C
    V, D = emb_ref.shape
    tb = rows // ctx

    # Batched gather via one-hot MXU matmul: (TB*C, V) @ (V, D).
    idx = idx_ref[...]                                            # (TB*C, 1)
    vocab_iota = lax.broadcasted_iota(jnp.int32, (rows, V), 1)    # (TB*C, V)
    onehot = (vocab_iota == idx).astype(jnp.float32)
    gathered = jnp.dot(onehot, emb_ref[...],
                       preferred_element_type=jnp.float32)        # (TB*C, D)

    # Embedding(max_norm=1): per-row renorm, vectorized over all TB*C rows.
    sumsq = jnp.sum(gathered * gathered, axis=-1, keepdims=True)  # (TB*C, 1)
    norm = jnp.sqrt(sumsq)
    scale = jnp.where(norm > MAX_NORM,
                      MAX_NORM / (norm + _RENORM_EPS),
                      jnp.float32(1.0))
    gathered = gathered * scale

    # Mean over the context window, then the linear layer on the whole tile.
    h = gathered.reshape(tb, ctx, D).mean(axis=1)                 # (TB, D)
    out = jnp.dot(h, w_ref[...], preferred_element_type=jnp.float32)
    out_ref[...] = out + b_ref[...]                               # (TB, O)


def word2vec_forward(idx, emb_table, lin_w, lin_b, *, tb_max=128):
    """idx: (B, C) int, emb_table: (V, D) f32, lin_w: (O, D) f32, lin_b: (O,) f32."""
    B, C = idx.shape
    V, D = emb_table.shape
    O = lin_w.shape[0]

    # Batch tile: multiple of 8 sublanes, capped at tb_max; pad B up to a
    # whole number of tiles (padded rows use index 0 and are sliced off).
    tb = min(tb_max, _round_up(B, 8))
    b_pad = pl.cdiv(B, tb) * tb

    idx_flat = idx.astype(jnp.int32).reshape(B * C, 1)
    if b_pad != B:
        idx_flat = jnp.pad(idx_flat, ((0, (b_pad - B) * C), (0, 0)))

    w_t = lin_w.T                    # (D, O): contraction dim on sublanes
    bias2 = lin_b.reshape(1, O)

    kernel = functools.partial(_cbow_kernel, ctx=C)
    out = pl.pallas_call(
        kernel,
        out_shape=jax.ShapeDtypeStruct((b_pad, O), jnp.float32),
        grid_spec=pltpu.PrefetchScalarGridSpec(
            num_scalar_prefetch=0,
            grid=(b_pad // tb,),
            in_specs=[
                pl.BlockSpec((tb * C, 1), lambda i: (i, 0)),   # indices per tile
                pl.BlockSpec((V, D), lambda i: (0, 0)),        # table resident
                pl.BlockSpec((D, O), lambda i: (0, 0)),        # weight resident
                pl.BlockSpec((1, O), lambda i: (0, 0)),        # bias
            ],
            out_specs=pl.BlockSpec((tb, O), lambda i: (i, 0)),
        ),
        compiler_params=pltpu.CompilerParams(
            dimension_semantics=("parallel",)),
    )(idx_flat, emb_table, w_t, bias2)
    return out[:B]


if __name__ == "__main__":
    # Small shapes consistent with the module:
    #   vocab V = 128, embedding_size D = 128, output_size O = V = 128
    #   batch B = 8, context window C = 8
    V, D, O = 128, 128, 128
    B, C = 8, 8

    key = jax.random.PRNGKey(0)
    k_emb, k_w, k_b, k_idx = jax.random.split(key, 4)

    emb_table = jax.random.normal(k_emb, (V, D), dtype=jnp.float32)
    lin_w = jax.random.normal(k_w, (O, D), dtype=jnp.float32) * 0.05
    lin_b = jax.random.normal(k_b, (O,), dtype=jnp.float32) * 0.05
    idx = jax.random.randint(k_idx, (B, C), 0, V, dtype=jnp.int32)

    out = jax.block_until_ready(word2vec_forward(idx, emb_table, lin_w, lin_b))

    # Pure-JAX reference (gather -> per-row max_norm renorm -> mean -> linear),
    # matching torch's renorm epsilon.
    gathered = jnp.take(emb_table, idx, axis=0)                    # (B, C, D)
    norms = jnp.linalg.norm(gathered, axis=-1, keepdims=True)
    gathered = gathered * jnp.where(norms > MAX_NORM,
                                    MAX_NORM / (norms + _RENORM_EPS), 1.0)
    ref = gathered.mean(axis=1) @ lin_w.T + lin_b

    assert out.shape == (B, O)
    assert jnp.allclose(out, ref, atol=1e-4, rtol=1e-4), float(
        jnp.max(jnp.abs(out - ref)))
    print("KERNEL_OK")
</pallas_src>

<mosaic_0001>
module attributes {stable_mosaic.version = 11 : i64} {
  func.func @_cbow_kernel(%arg0: i32, %arg1: memref<64x1xi32, #tpu.memory_space<vmem>>, %arg2: memref<128x128xf32, #tpu.memory_space<vmem>>, %arg3: memref<128x128xf32, #tpu.memory_space<vmem>>, %arg4: memref<1x128xf32, #tpu.memory_space<vmem>>, %arg5: memref<8x128xf32, #tpu.memory_space<vmem>>) attributes {dimension_semantics = [#tpu.dimension_semantics<parallel>], iteration_bounds = array<i64: 1>, scalar_prefetch = 0 : i64, scratch_operands = 0 : i64, tpu.core_type = #tpu.core_type<tc>, window_params = [{transform_indices = @transform_0, window_bounds = array<i64: 64, 1>}, {pipeline_mode = #tpu.pipeline_mode<synchronous>, transform_indices = @transform_1, window_bounds = array<i64: 128, 128>}, {pipeline_mode = #tpu.pipeline_mode<synchronous>, transform_indices = @transform_2, window_bounds = array<i64: 128, 128>}, {pipeline_mode = #tpu.pipeline_mode<synchronous>, transform_indices = @transform_3, window_bounds = array<i64: 1, 128>}, {transform_indices = @transform_4, window_bounds = array<i64: 8, 128>}]} {
    %c0 = arith.constant 0 : index
    %c0_0 = arith.constant 0 : index
    %0 = vector.load %arg1[%c0, %c0_0] : memref<64x1xi32, #tpu.memory_space<vmem>>, vector<64x1xi32>
    %1 = tpu.iota {dimensions = array<i32: 1>} : vector<64x128xi32>
    %2 = vector.broadcast %0 : vector<64x1xi32> to vector<64x128xi32>
    %3 = arith.cmpi eq, %1, %2 : vector<64x128xi32>
    %4 = arith.extui %3 : vector<64x128xi1> to vector<64x128xi32>
    %5 = arith.sitofp %4 : vector<64x128xi32> to vector<64x128xf32>
    %c0_1 = arith.constant 0 : index
    %c0_2 = arith.constant 0 : index
    %6 = vector.load %arg2[%c0_1, %c0_2] : memref<128x128xf32, #tpu.memory_space<vmem>>, vector<128x128xf32>
    %cst = arith.constant dense<0.000000e+00> : vector<64x128xf32>
    %7 = tpu.matmul %5, %6, %cst {dimension_numbers = #tpu.dot_dimension_numbers<[1], [0], [0], [1], [0, 0, 1, 1], [], []>} : vector<64x128xf32>, vector<128x128xf32>, vector<64x128xf32> -> vector<64x128xf32>
    %8 = arith.mulf %7, %7 : vector<64x128xf32>
    %cst_3 = arith.constant dense<0.000000e+00> : vector<64xf32>
    %9 = vector.multi_reduction <add>, %8, %cst_3 [1] : vector<64x128xf32> to vector<64xf32>
    %10 = vector.shape_cast %9 : vector<64xf32> to vector<64x1xf32>
    %11 = math.sqrt %10 : vector<64x1xf32>
    %cst_4 = arith.constant 1.000000e+00 : f32
    %12 = vector.broadcast %cst_4 : f32 to vector<64x1xf32>
    %13 = arith.cmpf ogt, %11, %12 : vector<64x1xf32>
    %cst_5 = arith.constant 1.000000e-07 : f32
    %14 = vector.broadcast %cst_5 : f32 to vector<64x1xf32>
    %15 = arith.addf %11, %14 : vector<64x1xf32>
    %cst_6 = arith.constant 1.000000e+00 : f32
    %16 = vector.broadcast %cst_6 : f32 to vector<64x1xf32>
    %17 = arith.divf %16, %15 : vector<64x1xf32>
    %cst_7 = arith.constant 1.000000e+00 : f32
    %18 = vector.broadcast %cst_7 : f32 to vector<64x1xf32>
    %19 = arith.select %13, %17, %18 : vector<64x1xi1>, vector<64x1xf32>
    %20 = vector.broadcast %19 : vector<64x1xf32> to vector<64x128xf32>
    %21 = arith.mulf %7, %20 : vector<64x128xf32>
    %22 = vector.shape_cast %21 : vector<64x128xf32> to vector<8x8x128xf32>
    %cst_8 = arith.constant dense<0.000000e+00> : vector<8x128xf32>
    %23 = vector.multi_reduction <add>, %22, %cst_8 [1] : vector<8x8x128xf32> to vector<8x128xf32>
    %cst_9 = arith.constant 8.000000e+00 : f32
    %24 = vector.broadcast %cst_9 : f32 to vector<8x128xf32>
    %25 = arith.divf %23, %24 : vector<8x128xf32>
    %c0_10 = arith.constant 0 : index
    %c0_11 = arith.constant 0 : index
    %26 = vector.load %arg3[%c0_10, %c0_11] : memref<128x128xf32, #tpu.memory_space<vmem>>, vector<128x128xf32>
    %cst_12 = arith.constant dense<0.000000e+00> : vector<8x128xf32>
    %27 = tpu.matmul %25, %26, %cst_12 {dimension_numbers = #tpu.dot_dimension_numbers<[1], [0], [0], [1], [0, 0, 1, 1], [], []>} : vector<8x128xf32>, vector<128x128xf32>, vector<8x128xf32> -> vector<8x128xf32>
    %c0_13 = arith.constant 0 : index
    %c0_14 = arith.constant 0 : index
    %28 = vector.load %arg4[%c0_13, %c0_14] : memref<1x128xf32, #tpu.memory_space<vmem>>, vector<1x128xf32>
    %29 = vector.broadcast %28 : vector<1x128xf32> to vector<8x128xf32>
    %30 = arith.addf %27, %29 : vector<8x128xf32>
    %c0_15 = arith.constant 0 : index
    %c0_16 = arith.constant 0 : index
    %31 = vector.load %arg5[%c0_15, %c0_16] : memref<8x128xf32, #tpu.memory_space<vmem>>, vector<8x128xf32>
    tpu.vector_store %arg5[%c0_15, %c0_16], %30 {strides = array<i32>} : memref<8x128xf32, #tpu.memory_space<vmem>>, vector<8x128xf32>,
    return
  }
  func.func @transform_0(%arg0: i32) -> (i32, i32) {
    %c0_i32 = arith.constant 0 : i32
    %c0_i32_0 = arith.constant 0 : i32
    return %arg0, %c0_i32 : i32, i32
  }
  func.func @transform_1(%arg0: i32) -> (i32, i32) {
    %c0_i32 = arith.constant 0 : i32
    %c0_i32_0 = arith.constant 0 : i32
    %c0_i32_1 = arith.constant 0 : i32
    return %c0_i32, %c0_i32_0 : i32, i32
  }
  func.func @transform_2(%arg0: i32) -> (i32, i32) {
    %c0_i32 = arith.constant 0 : i32
    %c0_i32_0 = arith.constant 0 : i32
    %c0_i32_1 = arith.constant 0 : i32
    return %c0_i32, %c0_i32_0 : i32, i32
  }
  func.func @transform_3(%arg0: i32) -> (i32, i32) {
    %c0_i32 = arith.constant 0 : i32
    %c0_i32_0 = arith.constant 0 : i32
    %c0_i32_1 = arith.constant 0 : i32
    return %c0_i32, %c0_i32_0 : i32, i32
  }
  func.func @transform_4(%arg0: i32) -> (i32, i32) {
    %c0_i32 = arith.constant 0 : i32
    %c0_i32_0 = arith.constant 0 : i32
    return %arg0, %c0_i32 : i32, i32
  }
}

</mosaic_0001>

<bundles_post_ra>
// kernel: tpu_custom_call.1
= control target key start
LH: loop header
LB: loop body
LE: loop exit
PB: predicated region body
PF: predicated region fallthrough
CT: control target
= control target key end

     0   :  { %9 = vsyncpa [#allocation3], 0  ;;  %s1139_s0 = inlined_call_operand.vmem [shape: s32[64,1], index: 0, kind: input, shape index: {}]   ;;  %s1140_s1 = inlined_call_operand.hbm [shape: f32[128,128], index: 1, kind: input, shape index: {}]   ;;  %s1141_s2 = inlined_call_operand.hbm [shape: f32[128,128], index: 2, kind: input, shape index: {}]   ;;  %s1142_s3 = inlined_call_operand.vmem [shape: f32[1,128], index: 3, kind: input, shape index: {}]   ;;  %s1143_s4 = inlined_call_operand.hbm [shape: f32[8,128], index: 4, kind: output, shape index: {}]  }
   0x1   :  { %10 = vsyncpa [#allocation6], 0 }
   0x2   :  { %11 = vsyncpa [#allocation4], 0  ;;  %s18_s17 = sshll.u32 %s1140_s1, 4  ;;  %s754_s18 = smov [#allocation2]   ;;  %s19_s17 = int_to_ptr.hbm [resolvable:$true] %s18_s17 }
   0x3   :  { %s20_s19 = sshll.u32 %s754_s18, 4  ;;  %s31_s22 = sshll.u32 %s1141_s2, 4  ;;  %s21_s19 = int_to_ptr.vmem [resolvable:$true] %s20_s19  ;;  %s32_s22 = int_to_ptr.hbm [resolvable:$true] %s31_s22 }
   0x4   :  { %s755_s23 = smov 128   ;;  %s756_s24 = smov 8  }
   0x5   :  { %26 = dma.hbm_to_vmem [thread:$0]  %s19_s17, 2048, %s21_s19, [#allocation3], %s755_s23, %s755_s23, %s756_s24  }
   0x6   :  { %s757_s25 = smov [#allocation5]  }
   0x7   :  { %s33_s26 = sshll.u32 %s757_s25, 4  ;;  %s34_s26 = int_to_ptr.vmem [resolvable:$true] %s33_s26 }
   0x8   :  { %39 = dma.hbm_to_vmem [thread:$0]  %s32_s22, 2048, %s34_s26, [#allocation6], %s755_s23, %s755_s23, %s756_s24  }
   0x9   :  { %748 = dma.done.wait [#allocation3], 2048  }
   0xa   :  { %749 = vsyncadd [#allocation3], 4294965248 }
   0xb   :  { %750 = dma.done.wait [#allocation6], 2048  }
   0xc   :  { %751 = vsyncadd [#allocation6], 4294965248  ;;  %v758_v0 = vmov 0   ;;  %v53_v1 = vld [vmem:[%s1139_s0 + $0x18] sm:$0xff]  ;;  %v52_v2 = vld [vmem:[%s1139_s0 + $0x10] sm:$0xff]  ;;  %v58_v25 = vlaneseq  ;;  %v759_v29 = vmov 1.0  }
   0xd   :  { %639 = vset.pattern.permute.xlu1 %v758_v0  ;;  %638 = vset.pattern.permute.xlu0 %v758_v0  ;;  %v56_v3 = vld [vmem:[%s1139_s0 + $0x30] sm:$0xff]  ;;  %v123_v4 = vld [vmem:[#allocation2 + $0x78] sm:$0xff]  ;;  %v121_v6 = vld [vmem:[#allocation2 + $0x68] sm:$0xff]  ;;  %s761_s16 = smov [#allocation7]   ;;  %s571_s20 = sshll.u32 %s1143_s4, 4  ;;  %s572_s20 = int_to_ptr.hbm [resolvable:$true] %s571_s20 }
   0xe   :  { %640 = vset.pattern.permute.xlu2 %v758_v0  ;;  %70 = vperm.xlu1 %639, %v53_v1   ;;  %v122_v5 = vld [vmem:[#allocation2 + $0x70] sm:$0xff]  ;;  %v55_v7 = vld [vmem:[%s1139_s0 + $0x28] sm:$0xff]  ;;  %v50_v8 = vld [vmem:[%s1139_s0] sm:$0xff]  ;;  %v59_v26 = vand.u32 127, %v58_v25  ;;  %s569_s17 = sshll.u32 %s761_s16, 4  ;;  %s570_s17 = int_to_ptr.vmem [resolvable:$true] %s569_s17 }
   0xf   :  { %67 = vperm.xlu0 %638, %v52_v2   ;;  %79 = vperm.xlu2 %640, %v56_v3   ;;  %v120_v9 = vld [vmem:[#allocation2 + $0x60] sm:$0xff]  ;;  %v119_v11 = vld [vmem:[#allocation2 + $0x58] sm:$0xff]  ;;  %v118_v12 = vld [vmem:[#allocation2 + $0x50] sm:$0xff] }
  0x10   :  { %598 = vmatpush.msra.mxu2 %v123_v4  ;;  %124 = vmatpush.msra.mxu0 %v123_v4  ;;  %v54_v10 = vld [vmem:[%s1139_s0 + $0x20] sm:$0xff]  ;;  %v117_v13 = vld [vmem:[#allocation2 + $0x48] sm:$0xff]  ;;  %v57_v15 = vld [vmem:[%s1139_s0 + $0x38] sm:$0xff] }
  0x11   :  { %599 = vmatpush.msra.mxu3 %v123_v4  ;;  %v51_v14 = vld [vmem:[%s1139_s0 + $0x8] sm:$0xff]  ;;  %v116_v16 = vld [vmem:[#allocation2 + $0x40] sm:$0xff]  ;;  %v115_v17 = vld [vmem:[#allocation2 + $0x38] sm:$0xff] }
  0x12   :  { %600 = vmatpush.msra.mxu2 %v122_v5  ;;  %125 = vmatpush.msra.mxu0 %v122_v5  ;;  %v114_v18 = vld [vmem:[#allocation2 + $0x30] sm:$0xff]  ;;  %v113_v19 = vld [vmem:[#allocation2 + $0x28] sm:$0xff]  ;;  %v112_v20 = vld [vmem:[#allocation2 + $0x20] sm:$0xff] }
  0x13   :  { %601 = vmatpush.msra.mxu3 %v122_v5  ;;  %v111_v21 = vld [vmem:[#allocation2 + $0x18] sm:$0xff]  ;;  %v110_v22 = vld [vmem:[#allocation2 + $0x10] sm:$0xff]  ;;  %v109_v23 = vld [vmem:[#allocation2 + $0x8] sm:$0xff] }
  0x14   :  { %602 = vmatpush.msra.mxu2 %v121_v6  ;;  %126 = vmatpush.msra.mxu0 %v121_v6  ;;  %v108_v24 = vld [vmem:[#allocation2] sm:$0xff] }
  0x15   :  { %603 = vmatpush.msra.mxu3 %v121_v6 }
  0x16   :  { %61 = vperm.xlu1 %639, %v50_v8   ;;  %604 = vmatpush.msra.mxu2 %v120_v9 }
  0x17   :  { %76 = vperm.xlu0 %638, %v55_v7   ;;  %127 = vmatpush.msra.mxu0 %v120_v9 }
  0x18   :  { %73 = vperm.xlu2 %640, %v54_v10   ;;  %605 = vmatpush.msra.mxu3 %v120_v9 }
  0x19   :  { %606 = vmatpush.msra.mxu2 %v119_v11  ;;  %128 = vmatpush.msra.mxu0 %v119_v11 }
  0x1a   :  { %607 = vmatpush.msra.mxu3 %v119_v11 }
  0x1b   :  { %608 = vmatpush.msra.mxu2 %v118_v12  ;;  %129 = vmatpush.msra.mxu0 %v118_v12 }
  0x1c   :  { %609 = vmatpush.msra.mxu3 %v118_v12 }
  0x1d   :  { %610 = vmatpush.msra.mxu2 %v117_v13  ;;  %130 = vmatpush.msra.mxu0 %v117_v13 }
  0x1e   :  { %82 = vperm.xlu1 %639, %v57_v15   ;;  %611 = vmatpush.msra.mxu3 %v117_v13 }
  0x1f   :  { %64 = vperm.xlu0 %638, %v51_v14   ;;  %612 = vmatpush.msra.mxu2 %v116_v16 }
  0x20   :  { %131 = vmatpush.msra.mxu0 %v116_v16  ;;  %613 = vmatpush.msra.mxu3 %v116_v16 }
  0x21   :  { %614 = vmatpush.msra.mxu2 %v115_v17 }
  0x22   :  { %132 = vmatpush.msra.mxu0 %v115_v17  ;;  %615 = vmatpush.msra.mxu3 %v115_v17 }
  0x23   :  { %616 = vmatpush.msra.mxu2 %v114_v18 }
  0x24   :  { %133 = vmatpush.msra.mxu0 %v114_v18  ;;  %617 = vmatpush.msra.mxu3 %v114_v18 }
  0x25   :  { %618 = vmatpush.msra.mxu2 %v113_v19 }
  0x26   :  { %134 = vmatpush.msra.mxu0 %v113_v19  ;;  %619 = vmatpush.msra.mxu3 %v113_v19 }
  0x27   :  { %620 = vmatpush.msra.mxu2 %v112_v20 }
  0x28   :  { %135 = vmatpush.msra.mxu0 %v112_v20  ;;  %621 = vmatpush.msra.mxu3 %v112_v20 }
  0x29   :  { %622 = vmatpush.msra.mxu2 %v111_v21 }
  0x2a   :  { %136 = vmatpush.msra.mxu0 %v111_v21  ;;  %623 = vmatpush.msra.mxu3 %v111_v21 }
  0x2b   :  { %624 = vmatpush.msra.mxu2 %v110_v22 }
  0x2c   :  { %137 = vmatpush.msra.mxu0 %v110_v22  ;;  %625 = vmatpush.msra.mxu3 %v110_v22 }
  0x2d   :  { %626 = vmatpush.msra.mxu2 %v109_v23 }
  0x2e   :  { %138 = vmatpush.msra.mxu0 %v109_v23  ;;  %627 = vmatpush.msra.mxu3 %v109_v23 }
  0x2f   :  { %628 = vmatpush.msra.mxu2 %v108_v24 }
  0x30   :  { %139 = vmatpush.msra.mxu0 %v108_v24  ;;  %629 = vmatpush.msra.mxu3 %v108_v24 }
  0x69   :  { %v80_v30 = vpop.permute.xlu2 %79 }
  0x6a   :  { %vm90_vm6 = vcmp.eq.s32.totalorder %v59_v26, %v80_v30 }
  0x72   :  { %v74_v33 = vpop.permute.xlu2 %73 }
  0x73   :  { %vm88_vm4 = vcmp.eq.s32.totalorder %v59_v26, %v74_v33 }
  0x80   :  { %v71_v27 = vpop.permute.xlu1 %70 }
  0x81   :  { %v68_v28 = vpop.permute.xlu0 %67  ;;  %vm87_vm1 = vcmp.eq.s32.totalorder %v59_v26, %v71_v27 }
  0x82   :  { %vm86_vm0 = vcmp.eq.s32.totalorder %v59_v26, %v68_v28 }
  0x83   :  { %592 = vmatmul.msk.f32.vlgmr.msra.gmra.mxu2 %vm86_vm0, %v759_v29 }
  0x88   :  { %v62_v32 = vpop.permute.xlu1 %61 }
  0x89   :  { %v77_v31 = vpop.permute.xlu0 %76  ;;  %vm84_vm3 = vcmp.eq.s32.totalorder %v59_v26, %v62_v32 }
  0x8a   :  { %vm89_vm2 = vcmp.eq.s32.totalorder %v59_v26, %v77_v31  ;;  %590 = vmatmul.msk.f32.vlgmr.msra.gmra.mxu0 %vm84_vm3, %v759_v29 }
  0x8b   :  { %593 = vmatmul.msk.f32.gmra.mxu2 %vm87_vm1, %v759_v29  ;;  %595 = vmatmul.msk.f32.vlgmr.msra.gmra.mxu3 %vm89_vm2, %v759_v29 }
  0x90   :  { %v83_v35 = vpop.permute.xlu1 %82 }
  0x91   :  { %v65_v34 = vpop.permute.xlu0 %64  ;;  %vm91_vm7 = vcmp.eq.s32.totalorder %v59_v26, %v83_v35 }
  0x92   :  { %vm85_vm5 = vcmp.eq.s32.totalorder %v59_v26, %v65_v34 }
  0x93   :  { %591 = vmatmul.msk.f32.gmra.mxu0 %vm85_vm5, %v759_v29  ;;  %594 = vmatmul.msk.f32.gmra.mxu2 %vm88_vm4, %v759_v29 }
  0x94   :  { %596 = vmatmul.msk.f32.gmra.mxu3 %vm90_vm6, %v759_v29 }
  0x9c   :  { %597 = vmatmul.msk.f32.gmra.mxu3 %vm91_vm7, %v759_v29 }
 0x106   :  { %v817_v36 = vpop.f32.mrf.mxu2 }
 0x107   :  { %v167_v37 = vmul.f32 %v817_v36, %v817_v36  ;;  %v821_v38 = vpop.f32.mrf.mxu0 }
 0x108   :  { %v165_v39 = vmul.f32 %v821_v38, %v821_v38 }
 0x109   :  { %177 = vadd.xlane.f32.xlu1 %v167_v37 }
 0x10a   :  { %173 = vadd.xlane.f32.xlu2 %v165_v39 }
 0x10e   :  { %v825_v40 = vpop.f32.mrf.mxu2  ;;  %v827_v41 = vpop.f32.mrf.mxu3 }
 0x10f   :  { %v168_v44 = vmul.f32 %v825_v40, %v825_v40  ;;  %v170_v49 = vmul.f32 %v827_v41, %v827_v41 }
 0x110   :  { %v829_v42 = vpop.f32.mrf.mxu0 }
 0x111   :  { %v166_v43 = vmul.f32 %v829_v42, %v829_v42 }
 0x112   :  { %179 = vadd.xlane.f32.xlu2 %v168_v44 }
 0x113   :  { %175 = vadd.xlane.f32.xlu0 %v166_v43 }
 0x116   :  { %v835_v45 = vpop.f32.mrf.mxu2 }
 0x117   :  { %v837_v46 = vpop.f32.mrf.mxu3  ;;  %v169_v48 = vmul.f32 %v835_v45, %v835_v45 }
 0x118   :  { %v171_v47 = vmul.f32 %v837_v46, %v837_v46 }
 0x11a   :  { %185 = vadd.xlane.f32.xlu1 %v171_v47  ;;  %181 = vadd.xlane.f32.xlu2 %v169_v48 }
 0x11b   :  { %183 = vadd.xlane.f32.xlu0 %v170_v49 }
 0x11f   :  { %v845_v50 = vpop.f32.mrf.mxu3 }
 0x120   :  { %v172_v51 = vmul.f32 %v845_v50, %v845_v50 }
 0x122   :  { %187 = vadd.xlane.f32.xlu2 %v172_v51 }
 0x17c   :  { %v178_v52 = vpop.xlane.xlu1 %177 }
 0x17d   :  { %642 = vrsqrt.f32 %v178_v52  ;;  %v174_v53 = vpop.xlane.xlu2 %173  ;;  %vm220_vm8 = vcmp.eq.f32.partialorder %v178_v52, inf  ;;  %vm222_vm9 = vcmp.eq.f32.partialorder %v178_v52, 0.0  ;;  %v223_v10 = vand.u32 2147483648, %v178_v52 }
 0x17e   :  { %644 = vrsqrt.f32 %v174_v53  ;;  %vm196_vm10 = vcmp.eq.f32.partialorder %v174_v53, inf  ;;  %v199_v16 = vand.u32 2147483648, %v174_v53  ;;  %vm198_vm11 = vcmp.eq.f32.partialorder %v174_v53, 0.0 }
 0x183   :  { %v643_v54 = vpop.eup %642 }
 0x184   :  { %v214_v55 = vmul.f32 %v643_v54, %v178_v52  ;;  %v645_v56 = vpop.eup %644 }
 0x185   :  { %v190_v58 = vmul.f32 %v645_v56, %v174_v53  ;;  %v849_v59 = vpop.xlane.xlu2 %179 }
 0x186   :  { %v215_v57 = vmul.f32 %v643_v54, %v214_v55  ;;  %v851_v60 = vpop.xlane.xlu0 %175  ;;  %646 = vrsqrt.f32 %v849_v59  ;;  %vm232_vm12 = vcmp.eq.f32.partialorder %v849_v59, inf  ;;  %vm234_vm13 = vcmp.eq.f32.partialorder %v849_v59, 0.0 }
 0x187   :  { %v191_v62 = vmul.f32 %v645_v56, %v190_v58  ;;  %648 = vrsqrt.f32 %v851_v60  ;;  %v235_v34 = vand.u32 2147483648, %v849_v59  ;;  %vm208_vm14 = vcmp.eq.f32.partialorder %v851_v60, inf }
 0x188   :  { %v216_v61 = vmul.f32 0.5, %v215_v57  ;;  %vm210_vm15 = vcmp.eq.f32.partialorder %v851_v60, 0.0  ;;  %v211_v48 = vand.u32 2147483648, %v851_v60 }
 0x189   :  { %v192_v0 = vmul.f32 0.5, %v191_v62 }
 0x18a   :  { %v217_v63 = vsub.f32 1.5, %v216_v61 }
 0x18b   :  { %v193_v2 = vsub.f32 1.5, %v192_v0 }
 0x18c   :  { %v218_v1 = vmul.f32 %v643_v54, %v217_v63  ;;  %v647_v3 = vpop.eup %646 }
 0x18d   :  { %v855_v4 = vpop.xlane.xlu1 %185  ;;  %v649_v5 = vpop.eup %648  ;;  %v194_v7 = vmul.f32 %v645_v56, %v193_v2  ;;  %v226_v8 = vmul.f32 %v647_v3, %v849_v59 }
 0x18e   :  { %v219_v6 = vmul.f32 %v218_v1, %v178_v52  ;;  %650 = vrsqrt.f32 %v855_v4  ;;  %v859_v9 = vpop.xlane.xlu2 %181  ;;  %v202_v11 = vmul.f32 %v649_v5, %v851_v60  ;;  %v868_v21 = vpop.xlane.xlu0 %183  ;;  %vm268_vm0 = vcmp.eq.f32.partialorder %v855_v4, inf }
 0x18f   :  { %v195_v13 = vmul.f32 %v194_v7, %v174_v53  ;;  %v227_v14 = vmul.f32 %v647_v3, %v226_v8  ;;  %652 = vrsqrt.f32 %v859_v9  ;;  %vm270_vm1 = vcmp.eq.f32.partialorder %v855_v4, 0.0 }
 0x190   :  { %v221_v12 = vsel %vm220_vm8, %v178_v52, %v219_v6  ;;  %v203_v17 = vmul.f32 %v649_v5, %v202_v11  ;;  %vm244_vm5 = vcmp.eq.f32.partialorder %v859_v9, inf  ;;  %vm246_vm8 = vcmp.eq.f32.partialorder %v859_v9, 0.0 }
 0x191   :  { %v863_v15 = vsel %vm222_vm9, %v223_v10, %v221_v12  ;;  %v197_v19 = vsel %vm196_vm10, %v174_v53, %v195_v13  ;;  %v228_v20 = vmul.f32 0.5, %v227_v14 }
 0x192   :  { %v866_v18 = vadd.f32 1e-07, %v863_v15  ;;  %v870_v22 = vsel %vm198_vm11, %v199_v16, %v197_v19  ;;  %v204_v23 = vmul.f32 0.5, %v203_v17  ;;  %vm287_vm9 = vcmp.gt.f32.partialorder %v863_v15, 1.0 }
 0x193   :  { %v874_v25 = vadd.f32 1e-07, %v870_v22  ;;  %v229_v26 = vsub.f32 1.5, %v228_v20  ;;  %vm285_vm4 = vcmp.gt.f32.partialorder %v870_v22, 1.0 }
 0x194   :  { %v651_v24 = vpop.eup %650  ;;  %654 = vrcp.f32 %v866_v18  ;;  %v205_v27 = vsub.f32 1.5, %v204_v23  ;;  %vm336_vm2 = vweird.f32 %v866_v18  ;;  %v340_v6 = vand.u32 2147483647, %v866_v18 }
 0x195   :  { %656 = vrsqrt.f32 %v868_v21  ;;  %v877_v28 = vpop.eup %652  ;;  %v262_v29 = vmul.f32 %v651_v24, %v855_v4  ;;  %v230_v30 = vmul.f32 %v647_v3, %v229_v26  ;;  %v342_v7 = vand.u32 2147483648, %v866_v18 }
 0x196   :  { %658 = vrcp.f32 %v874_v25  ;;  %v206_v31 = vmul.f32 %v649_v5, %v205_v27  ;;  %v238_v33 = vmul.f32 %v877_v28, %v859_v9  ;;  %v901_v54 = vpop.xlane.xlu2 %187  ;;  %v247_v5 = vand.u32 2147483648, %v859_v9 }
 0x197   :  { %v263_v32 = vmul.f32 %v651_v24, %v262_v29  ;;  %v231_v37 = vmul.f32 %v230_v30, %v849_v59  ;;  %660 = vrsqrt.f32 %v901_v54  ;;  %v312_v10 = vand.u32 2147483648, %v874_v25 }
 0x198   :  { %v207_v39 = vmul.f32 %v206_v31, %v851_v60  ;;  %v239_v49 = vmul.f32 %v877_v28, %v238_v33  ;;  %v310_v12 = vand.u32 2147483647, %v874_v25  ;;  %vm306_vm7 = vweird.f32 %v874_v25 }
 0x199   :  { %v264_v43 = vmul.f32 0.5, %v263_v32  ;;  %v233_v51 = vsel %vm232_vm12, %v849_v59, %v231_v37  ;;  %vm941_vm10 = vcmp.eq.f32.partialorder %v340_v6, 8.507059e+37  ;;  %v343_v23 = vor.u32 1.1754944e-38, %v342_v7  ;;  %v513_v7 = vld [vmem:[#allocation5 + $0x68] sm:$0xff] }
 0x19a   :  { %v886_v35 = vpop.eup %654  ;;  %v209_v52 = vsel %vm208_vm14, %v851_v60, %v207_v39  ;;  %v905_v57 = vsel %vm234_vm13, %v235_v34, %v233_v51  ;;  %v271_v60 = vand.u32 2147483648, %v855_v4  ;;  %v240_v1 = vmul.f32 0.5, %v239_v49 }
 0x19b   :  { %v891_v44 = vpop.eup %656  ;;  %v332_v47 = vmul.f32 %v886_v35, %v866_v18  ;;  %v265_v53 = vsub.f32 1.5, %v264_v43  ;;  %v907_v58 = vsel %vm210_vm15, %v211_v48, %v209_v52  ;;  %v912_v62 = vadd.f32 1e-07, %v905_v57 }
 0x19c   :  { %v659_v55 = vpop.eup %658  ;;  %v250_v63 = vmul.f32 %v891_v44, %v868_v21  ;;  %v918_v0 = vadd.f32 1e-07, %v907_v58  ;;  %v241_v14 = vsub.f32 1.5, %v240_v1  ;;  %vm337_vm6 = vweird.f32 %v886_v35 }
 0x19d   :  { %v333_v56 = vsub.f32 1.0, %v332_v47  ;;  %v302_v61 = vmul.f32 %v659_v55, %v874_v25  ;;  %v266_v59 = vmul.f32 %v651_v24, %v265_v53  ;;  %662 = vrcp.f32 %v912_v62  ;;  %v938_v19 = vpop.eup %660  ;;  %vm966_vm12 = vmor %vm336_vm2, %vm337_vm6 }
 0x19e   :  { %664 = vrcp.f32 %v918_v0  ;;  %vm307_vm3 = vweird.f32 %v659_v55  ;;  %v251_v11 = vmul.f32 %v891_v44, %v250_v63  ;;  %v242_v26 = vmul.f32 %v877_v28, %v241_v14  ;;  %v512_v14 = vld [vmem:[#allocation5 + $0x60] sm:$0xff] }
 0x19f   :  { %v334_v2 = vmul.f32 %v886_v35, %v333_v56  ;;  %v303_v3 = vsub.f32 1.0, %v302_v61  ;;  %v267_v13 = vmul.f32 %v266_v59, %v855_v4  ;;  %vm946_vm11 = vmor %vm306_vm7, %vm307_vm3  ;;  %v313_v30 = vor.u32 1.1754944e-38, %v312_v10  ;;  %v515_v61 = vld [vmem:[#allocation5 + $0x78] sm:$0xff] }
 0x1a0   :  { %v252_v32 = vmul.f32 0.5, %v251_v11  ;;  %vm311_vm13 = vcmp.eq.f32.partialorder %v310_v12, 8.507059e+37  ;;  %v355_v37 = vand.u32 2147483647, %v912_v62  ;;  %v274_v18 = vmul.f32 %v938_v19, %v901_v54  ;;  %543 = vmatpush.msra.mxu1 %v515_v61 }
 0x1a1   :  { %v304_v8 = vmul.f32 %v659_v55, %v303_v3  ;;  %v335_v16 = vadd.f32 %v886_v35, %v334_v2  ;;  %v269_v25 = vsel %vm268_vm0, %v855_v4, %v267_v13  ;;  %v259_v4 = vand.u32 2147483648, %v868_v21 }
 0x1a2   :  { %v960_v31 = vsel %vm270_vm1, %v271_v60, %v269_v25  ;;  %vm286_vm14 = vcmp.gt.f32.partialorder %v907_v58, 1.0  ;;  %v325_v49 = vand.u32 2147483647, %v918_v0  ;;  %v243_v52 = vmul.f32 %v242_v26, %v859_v9  ;;  %v514_v60 = vld [vmem:[#allocation5 + $0x70] sm:$0xff] }
 0x1a3   :  { %v305_v17 = vadd.f32 %v659_v55, %v304_v8  ;;  %v954_v27 = vpop.eup %662  ;;  %v339_v39 = vsel %vm966_vm12, %v886_v35, %v335_v16  ;;  %v983_v51 = vadd.f32 1e-07, %v960_v31  ;;  %v357_v53 = vand.u32 2147483648, %v912_v62  ;;  %544 = vmatpush.msra.mxu1 %v514_v60  ;;  %v511_v16 = vld [vmem:[#allocation5 + $0x58] sm:$0xff] }
 0x1a4   :  { %v665_v33 = vpop.eup %664  ;;  %v347_v28 = vmul.f32 %v954_v27, %v912_v62  ;;  %v327_v35 = vand.u32 2147483648, %v918_v0  ;;  %v253_v56 = vsub.f32 1.5, %v252_v32  ;;  %vm256_vm15 = vcmp.eq.f32.partialorder %v868_v21, inf  ;;  %v510_v32 = vld [vmem:[#allocation5 + $0x50] sm:$0xff] }
 0x1a5   :  { %v309_v29 = vsel %vm946_vm11, %v659_v55, %v305_v17  ;;  %v317_v47 = vmul.f32 %v665_v33, %v918_v0  ;;  %v344_v63 = vsel %vm941_vm10, %v343_v23, %v339_v39  ;;  %666 = vrcp.f32 %v983_v51  ;;  %545 = vmatpush.msra.mxu1 %v513_v7  ;;  %v509_v39 = vld [vmem:[#allocation5 + $0x48] sm:$0xff] }
 0x1a6   :  { %v314_v43 = vsel %vm311_vm13, %v313_v30, %v309_v29  ;;  %v348_v48 = vsub.f32 1.0, %v347_v28  ;;  %vm258_vm0 = vcmp.eq.f32.partialorder %v868_v21, 0.0  ;;  %vm322_vm1 = vweird.f32 %v665_v33 }
 0x1a7   :  { %v318_v55 = vsub.f32 1.0, %v317_v47  ;;  %v421_v59 = vsel %vm285_vm4, %v314_v43, 1.0  ;;  %v245_v3 = vsel %vm244_vm5, %v859_v9, %v243_v52  ;;  %v275_v6 = vmul.f32 %v938_v19, %v274_v18  ;;  %546 = vmatpush.msra.mxu1 %v512_v14 }
 0x1a8   :  { %v349_v1 = vmul.f32 %v954_v27, %v348_v48  ;;  %vm352_vm2 = vweird.f32 %v954_v27  ;;  %v1006_v22 = vsel %vm246_vm8, %v247_v5, %v245_v3  ;;  %v254_v10 = vmul.f32 %v891_v44, %v253_v56  ;;  %v506_v3 = vld [vmem:[#allocation5 + $0x30] sm:$0xff] }
 0x1a9   :  { %v319_v2 = vmul.f32 %v665_v33, %v318_v55  ;;  %v423_v11 = vsel %vm287_vm9, %v344_v63, 1.0  ;;  %v429_v12 = vmul.f32 %v421_v59, %v821_v38  ;;  %vm288_vm3 = vcmp.gt.f32.partialorder %v905_v57, 1.0  ;;  %547 = vmatpush.msra.mxu1 %v511_v16  ;;  %v504_v38 = vld [vmem:[#allocation5 + $0x20] sm:$0xff] }
 0x1aa   :  { %v350_v8 = vadd.f32 %v954_v27, %v349_v1  ;;  %vm321_vm4 = vweird.f32 %v918_v0  ;;  %vm351_vm5 = vweird.f32 %v912_v62  ;;  %v328_v9 = vor.u32 1.1754944e-38, %v327_v35 }
 0x1ab   :  { %v320_v13 = vadd.f32 %v665_v33, %v319_v2  ;;  %vm323_vm6 = vmor %vm321_vm4, %vm322_vm1  ;;  %v1017_v5 = vadd.f32 1e-07, %v1006_v22  ;;  %v255_v44 = vmul.f32 %v254_v10, %v868_v21  ;;  %vm1026_vm8 = vcmp.eq.f32.partialorder %v355_v37, 8.507059e+37  ;;  %v667_v17 = vpop.eup %666  ;;  %548 = vmatpush.msra.mxu1 %v510_v32 }
 0x1ac   :  { %vm1022_vm7 = vmor %vm351_vm5, %vm352_vm2  ;;  %vm326_vm9 = vcmp.eq.f32.partialorder %v325_v49, 8.507059e+37  ;;  %v276_v0 = vmul.f32 0.5, %v275_v6  ;;  %v1031_v20 = vmul.f32 %v423_v11, %v817_v36  ;;  %v437_v25 = vrot.slane %v429_v12, 4 }
 0x1ad   :  { %v324_v62 = vsel %vm323_vm6, %v665_v33, %v320_v13  ;;  %v354_v23 = vsel %vm1022_vm7, %v954_v27, %v350_v8  ;;  %668 = vrcp.f32 %v1017_v5  ;;  %v358_v26 = vor.u32 1.1754944e-38, %v357_v53  ;;  %549 = vmatpush.msra.mxu1 %v509_v39 }
 0x1ae   :  { %v329_v24 = vsel %vm326_vm9, %v328_v9, %v324_v62  ;;  %v392_v30 = vmul.f32 %v667_v17, %v983_v51  ;;  %v400_v36 = vand.u32 2147483647, %v983_v51  ;;  %v402_v34 = vand.u32 2147483648, %v983_v51 }
 0x1af   :  { %v422_v29 = vsel %vm286_vm14, %v329_v24, 1.0  ;;  %v257_v27 = vsel %vm256_vm15, %v868_v21, %v255_v44  ;;  %v359_v28 = vsel %vm1026_vm8, %v358_v26, %v354_v23  ;;  %v449_v43 = vrot.slane %v1031_v20, 4  ;;  %v508_v21 = vld [vmem:[#allocation5 + $0x40] sm:$0xff]  ;;  %v503_v24 = vld [vmem:[#allocation5 + $0x18] sm:$0xff] }
 0x1b0   :  { %v430_v33 = vmul.f32 %v422_v29, %v829_v42  ;;  %v393_v37 = vsub.f32 1.0, %v392_v30  ;;  %v1052_v58 = vsel %vm258_vm0, %v259_v4, %v257_v27  ;;  %v277_v42 = vsub.f32 1.5, %v276_v0  ;;  %550 = vmatpush.msra.mxu1 %v508_v21 }
 0x1b1   :  { %vm291_vm10 = vcmp.gt.f32.partialorder %v960_v31, 1.0  ;;  %vm397_vm11 = vweird.f32 %v667_v17  ;;  %vm280_vm12 = vcmp.eq.f32.partialorder %v901_v54, inf  ;;  %v1058_v48 = vadd.f32 1e-07, %v1052_v58 }
 0x1b2   :  { %v443_v47 = vrot.slane %v430_v33, 4  ;;  %v394_v18 = vmul.f32 %v667_v17, %v393_v37  ;;  %v278_v49 = vmul.f32 %v938_v19, %v277_v42  ;;  %v438_v52 = vadd.f32 %v437_v25, %v429_v12  ;;  %v507_v19 = vld [vmem:[#allocation5 + $0x38] sm:$0xff]  ;;  %v505_v12 = vld [vmem:[#allocation5 + $0x28] sm:$0xff] }
 0x1b3   :  { %v669_v4 = vpop.eup %668  ;;  %v424_v53 = vsel %vm288_vm3, %v359_v28, 1.0  ;;  %vm396_vm13 = vweird.f32 %v983_v51  ;;  %vm1064_vm14 = vcmp.eq.f32.partialorder %v400_v36, 8.507059e+37  ;;  %v403_v56 = vor.u32 1.1754944e-38, %v402_v34  ;;  %551 = vmatpush.msra.mxu1 %v507_v19  ;;  %v502_v36 = vld [vmem:[#allocation5 + $0x10] sm:$0xff] }
 0x1b4   :  { %v395_v35 = vadd.f32 %v667_v17, %v394_v18  ;;  %v362_v61 = vmul.f32 %v669_v4, %v1017_v5  ;;  %670 = vrcp.f32 %v1058_v48  ;;  %vm398_vm15 = vmor %vm396_vm13, %vm397_vm11  ;;  %v370_v60 = vand.u32 2147483647, %v1017_v5 }
 0x1b5   :  { %v279_v57 = vmul.f32 %v278_v49, %v901_v54  ;;  %vm282_vm0 = vcmp.eq.f32.partialorder %v901_v54, 0.0  ;;  %v283_v51 = vand.u32 2147483648, %v901_v54  ;;  %v432_v63 = vmul.f32 %v424_v53, %v825_v40  ;;  %552 = vmatpush.msra.mxu1 %v506_v3 }
 0x1b6   :  { %v444_v59 = vadd.f32 %v443_v47, %v430_v33  ;;  %v399_v1 = vsel %vm398_vm15, %v667_v17, %v395_v35  ;;  %v363_v2 = vsub.f32 1.0, %v362_v61  ;;  %v372_v7 = vand.u32 2147483648, %v1017_v5 }
 0x1b7   :  { %v404_v6 = vsel %vm1064_vm14, %v403_v56, %v399_v1  ;;  %v281_v8 = vsel %vm280_vm12, %v901_v54, %v279_v57  ;;  %vm367_vm1 = vweird.f32 %v669_v4  ;;  %v439_v40 = vrot.slane %v438_v52, 2  ;;  %553 = vmatpush.msra.mxu1 %v505_v12 }
 0x1b8   :  { %v364_v10 = vmul.f32 %v669_v4, %v363_v2  ;;  %v1082_v11 = vsel %vm282_vm0, %v283_v51, %v281_v8  ;;  %vm289_vm2 = vcmp.gt.f32.partialorder %v1006_v22, 1.0  ;;  %vm366_vm3 = vweird.f32 %v1017_v5 }
 0x1b9   :  { %vm1086_vm4 = vcmp.eq.f32.partialorder %v370_v60, 8.507059e+37  ;;  %v1091_v14 = vadd.f32 1e-07, %v1082_v11  ;;  %v427_v9 = vsel %vm291_vm10, %v404_v6, 1.0  ;;  %v445_v15 = vrot.slane %v444_v59, 2  ;;  %vm368_vm5 = vmor %vm366_vm3, %vm367_vm1  ;;  %554 = vmatpush.msra.mxu1 %v504_v38 }
 0x1ba   :  { %v671_v54 = vpop.eup %670  ;;  %v365_v44 = vadd.f32 %v669_v4, %v364_v10  ;;  %v760_v62 = vmov 8.0   ;;  %v373_v5 = vor.u32 1.1754944e-38, %v372_v7  ;;  %v455_v16 = vrot.slane %v432_v63, 4 }
 0x1bb   :  { %672 = vrcp.f32 %v760_v62  ;;  %v377_v0 = vmul.f32 %v671_v54, %v1058_v48  ;;  %v385_v23 = vand.u32 2147483647, %v1058_v48  ;;  %v1099_v31 = vadd.f32 %v439_v40, %v438_v52  ;;  %555 = vmatpush.msra.mxu1 %v503_v24 }
 0x1bc   :  { %674 = vrcp.f32 %v1091_v14  ;;  %v369_v17 = vsel %vm368_vm5, %v669_v4, %v365_v44  ;;  %v450_v25 = vadd.f32 %v449_v43, %v1031_v20  ;;  %v387_v30 = vand.u32 2147483648, %v1058_v48 }
 0x1bd   :  { %v374_v26 = vsel %vm1086_vm4, %v373_v5, %v369_v17  ;;  %v378_v29 = vsub.f32 1.0, %v377_v0  ;;  %v435_v32 = vmul.f32 %v427_v9, %v837_v46  ;;  %vm290_vm6 = vcmp.gt.f32.partialorder %v1052_v58, 1.0  ;;  %v501_v46 = vld [vmem:[#allocation5 + $0x8] sm:$0xff]  ;;  %556 = vmatpush.msra.mxu1 %v502_v36 }
 0x1be   :  { %v425_v33 = vsel %vm289_vm2, %v374_v26, 1.0  ;;  %v446_v34 = vadd.f32 %v445_v15, %v444_v59  ;;  %vm382_vm7 = vweird.f32 %v671_v54  ;;  %v456_v28 = vadd.f32 %v455_v16, %v432_v63 }
 0x1bf   :  { %v379_v27 = vmul.f32 %v671_v54, %v378_v29  ;;  %v433_v20 = vmul.f32 %v425_v33, %v835_v45  ;;  %vm381_vm8 = vweird.f32 %v1058_v48  ;;  %vm1113_vm9 = vcmp.eq.f32.partialorder %v385_v23, 8.507059e+37  ;;  %v500_v45 = vld [vmem:[#allocation5] sm:$0xff]  ;;  %557 = vmatpush.msra.mxu1 %v501_v46 }
 0x1c0   :  { %v441_v22 = vrot.slane %v1099_v31, 1  ;;  %v451_v39 = vrot.slane %v450_v25, 2  ;;  %v388_v18 = vor.u32 1.1754944e-38, %v387_v30  ;;  %v473_v21 = vrot.slane %v435_v32, 4  ;;  %vm383_vm10 = vmor %vm381_vm8, %vm382_vm7 }
 0x1c1   :  { %v673_v37 = vpop.eup %672  ;;  %v380_v47 = vadd.f32 %v671_v54, %v379_v27  ;;  %v461_v49 = vrot.slane %v433_v20, 4  ;;  %vm411_vm11 = vweird.f32 %v1091_v14  ;;  %v415_v48 = vand.u32 2147483647, %v1091_v14  ;;  %558 = vmatpush.msra.mxu1 %v500_v45 }
 0x1c2   :  { %v675_v43 = vpop.eup %674  ;;  %v486_v52 = vmul.f32 8.0, %v673_v37  ;;  %v447_v55 = vrot.slane %v446_v34, 1  ;;  %v457_v35 = vrot.slane %v456_v28, 2  ;;  %v452_v60 = vadd.f32 %v451_v39, %v450_v25 }
 0x1c3   :  { %v407_v4 = vmul.f32 %v675_v43, %v1091_v14  ;;  %v384_v53 = vsel %vm383_vm10, %v671_v54, %v380_v47  ;;  %v462_v56 = vadd.f32 %v461_v49, %v433_v20  ;;  %v417_v63 = vand.u32 2147483648, %v1091_v14 }
 0x1c4   :  { %v389_v61 = vsel %vm1113_vm9, %v388_v18, %v384_v53  ;;  %v487_v57 = vsub.f32 1.0, %v486_v52  ;;  %v474_v1 = vadd.f32 %v473_v21, %v435_v32  ;;  %vm412_vm12 = vweird.f32 %v675_v43  ;;  %v641_v53 = vld [vmem:[%s1142_s3] ss:$0 sm:$0xff] }
 0x1c5   :  { %v408_v19 = vsub.f32 1.0, %v407_v4  ;;  %v426_v51 = vsel %vm290_vm6, %v389_v61, 1.0  ;;  %v463_v59 = vrot.slane %v462_v56, 2  ;;  %v448_v7 = vadd.f32 %v447_v55, %v446_v34  ;;  %vm413_vm14 = vmor %vm411_vm11, %vm412_vm12 }
 0x1c6   :  { %v434_v2 = vmul.f32 %v426_v51, %v827_v41  ;;  %v488_v6 = vmul.f32 %v673_v37, %v487_v57  ;;  %v458_v8 = vadd.f32 %v457_v35, %v456_v28  ;;  %vm490_vm13 = vweird.f32 %v673_v37 }
 0x1c7   :  { %v409_v3 = vmul.f32 %v675_v43, %v408_v19  ;;  %v464_v10 = vadd.f32 %v463_v59, %v462_v56  ;;  %v453_v40 = vrot.slane %v452_v60, 1  ;;  %vm416_vm15 = vcmp.eq.f32.partialorder %v415_v48, 8.507059e+37 }
 0x1c8   :  { %v467_v13 = vrot.slane %v434_v2, 4  ;;  %v489_v54 = vadd.f32 %v673_v37, %v488_v6  ;;  %v418_v58 = vor.u32 1.1754944e-38, %v417_v63  ;;  %v442_v9 = vadd.f32 %v441_v22, %v1099_v31 }
 0x1c9   :  { %v410_v12 = vadd.f32 %v675_v43, %v409_v3  ;;  %v475_v44 = vrot.slane %v474_v1, 2  ;;  %v465_v38 = vrot.slane %v464_v10, 1  ;;  %vm292_vm0 = vcmp.gt.f32.partialorder %v1082_v11, 1.0 }
 0x1ca   :  { %v468_v15 = vadd.f32 %v467_v13, %v434_v2  ;;  %v491_v62 = vsel %vm490_vm13, %v673_v37, %v489_v54  ;;  %v459_v0 = vrot.slane %v458_v8, 1  ;;  %v454_v23 = vadd.f32 %v453_v40, %v452_v60 }
 0x1cb   :  { %v414_v41 = vsel %vm413_vm14, %v675_v43, %v410_v12  ;;  %v493_v16 = vmul.f32 %v491_v62, %v448_v7  ;;  %vm528_vm1 = vcmask 1041409   ;;  %v492_v25 = vmul.f32 %v491_v62, %v442_v9 }
 0x1cc   :  { %v419_v5 = vsel %vm416_vm15, %v418_v58, %v414_v41  ;;  %v469_v24 = vrot.slane %v468_v15, 2  ;;  %v466_v26 = vadd.f32 %v465_v38, %v464_v10  ;;  %v476_v31 = vadd.f32 %v475_v44, %v474_v1 }
 0x1cd   :  { %v428_v17 = vsel %vm292_vm0, %v419_v5, 1.0  ;;  %v460_v30 = vadd.f32 %v459_v0, %v458_v8  ;;  %v529_v33 = vsel %vm528_vm1, %v493_v16, %v492_v25  ;;  %vm530_vm2 = vcmask 1042434  }
 0x1ce   :  { %v436_v14 = vmul.f32 %v428_v17, %v845_v50  ;;  %v470_v29 = vadd.f32 %v469_v24, %v468_v15  ;;  %v494_v34 = vmul.f32 %v491_v62, %v454_v23  ;;  %vm532_vm3 = vcmask 1043459  }
 0x1cf   :  { %v477_v20 = vrot.slane %v476_v31, 1  ;;  %v496_v28 = vmul.f32 %v491_v62, %v466_v26  ;;  %v495_v46 = vmul.f32 %v491_v62, %v460_v30  ;;  %vm534_vm4 = vcmask 1044484  }
 0x1d0   :  { %v479_v32 = vrot.slane %v436_v14, 4  ;;  %v471_v36 = vrot.slane %v470_v29, 1  ;;  %v531_v37 = vsel %vm530_vm2, %v494_v34, %v529_v33  ;;  %vm536_vm5 = vcmask 1045509  }
 0x1d1   :  { %v533_v39 = vsel %vm532_vm3, %v495_v46, %v531_v37  ;;  %v478_v43 = vadd.f32 %v477_v20, %v476_v31  ;;  %vm538_vm6 = vcmask 1046534   ;;  %vm540_vm7 = vcmask 1047559  }
 0x1d2   :  { %v480_v11 = vadd.f32 %v479_v32, %v436_v14  ;;  %v472_v27 = vadd.f32 %v471_v36, %v470_v29  ;;  %v535_v47 = vsel %vm534_vm4, %v496_v28, %v533_v39 }
 0x1d3   :  { %v498_v45 = vmul.f32 %v491_v62, %v478_v43 }
 0x1d4   :  { %v481_v42 = vrot.slane %v480_v11, 2  ;;  %v497_v22 = vmul.f32 %v491_v62, %v472_v27 }
 0x1d6   :  { %v482_v50 = vadd.f32 %v481_v42, %v480_v11  ;;  %v537_v21 = vsel %vm536_vm5, %v497_v22, %v535_v47 }
 0x1d7   :  { %v539_v48 = vsel %vm538_vm6, %v498_v45, %v537_v21 }
 0x1d8   :  { %v483_v18 = vrot.slane %v482_v50, 1 }
 0x1da   :  { %v484_v49 = vadd.f32 %v483_v18, %v482_v50 }
 0x1dc   :  { %v499_v4 = vmul.f32 %v491_v62, %v484_v49 }
 0x1de   :  { %v541_v52 = vsel %vm540_vm7, %v499_v4, %v539_v48 }
 0x1df   :  { %559 = vmatmul.f32.vlgmr.msra.gmra.mxu1 %v541_v52 }
 0x25c   :  { %v560_v55 = vpop.f32.mrf.mxu1 }
 0x25d   :  { %v561_v35 = vadd.f32 %v641_v53, %v560_v55 }
 0x25f   :  { %563 = vst [vmem:[#allocation7] sm:$0xff] %v561_v35 }
 0x260   :  { %574 = dma.vmem_to_hbm [thread:$0]  %s570_s17, 128, %s572_s20, [#allocation4]  }
 0x261   :  { %752 = dma.done.wait [#allocation4], 128  }
 0x262   :  { %753 = vsyncadd [#allocation4], 4294967168 }
 0x263   :  { %579 = vsyncpa [#allocation3], 1 }
 0x264   :  { %580 = vsyncpa [#allocation6], 1 }
 0x265   :  { %581 = vsyncpa [#allocation4], 1 }

</bundles_post_ra>
